<compile_context>
chip_gen: v6e
topology: v6e:2x2x1
jax: 0.10.0
libtpu: 0.0.40
codegen_flags: <defaults>
</compile_context>

<pallas_src>
import functools
from typing import List, Tuple

import jax
import jax.numpy as jnp
from jax.experimental import pallas as pl
from jax.experimental.pallas import tpu as pltpu


# --------------------------------------------------------------------------
# Pallas kernel: one fused ConvLSTM cell step over an N-tile of B*H*W
# --------------------------------------------------------------------------
def _convlstm_cell_kernel(w_ref, b_ref, x_ref, c_prev_ref, h_out_ref, c_out_ref):
    # w_ref : (4*Cout, Kpad) bf16   fused, transposed gate weights (K zero-padded)
    # b_ref : (4*Cout, 1)    f32    fused gate bias
    # x_ref : (Kpad, TN)     bf16   im2col(concat([inputs, h_prev]))^T tile
    # c_prev_ref / h_out_ref / c_out_ref : (Cout, TN) f32 (lane-dense)
    cout = c_prev_ref.shape[0]

    # Single MXU matmul for all four gates, f32 accumulation.
    gates = jnp.dot(w_ref[...], x_ref[...],
                    preferred_element_type=jnp.float32) + b_ref[...]

    i = jax.nn.sigmoid(gates[0 * cout:1 * cout, :])
    f = jax.nn.sigmoid(gates[1 * cout:2 * cout, :])
    o = jax.nn.sigmoid(gates[2 * cout:3 * cout, :])
    g = jnp.tanh(gates[3 * cout:4 * cout, :])

    c_new = f * c_prev_ref[...] + i * g
    h_out_ref[...] = o * jnp.tanh(c_new)
    c_out_ref[...] = c_new


def _pick_tile_n(n: int, max_tile: int = 1024) -> int:
    """Largest lane-aligned (multiple-of-128) divisor of n that still yields
    >= 2 grid steps (so v7x's two TensorCores both get work); else full n."""
    t = (min(max_tile, n // 2) // 128) * 128
    while t >= 128:
        if n % t == 0:
            return t
        t -= 128
    return n


def convlstm_cell_pallas(w_t, b, x_col_t, c_prev):
    """w_t: (4*Cout, Kpad) bf16, b: (4*Cout, 1) f32,
    x_col_t: (Kpad, N) bf16, c_prev: (Cout, N) f32  ->  (h_new, c_new)."""
    gc, kpad = w_t.shape
    n = x_col_t.shape[1]
    cout = c_prev.shape[0]
    tn = _pick_tile_n(n)

    cost = pl.CostEstimate(
        flops=2 * gc * kpad * n,
        transcendentals=5 * cout * n,
        bytes_accessed=(w_t.size * 2 + b.size * 4 + x_col_t.size * 2
                        + 3 * c_prev.size * 4),
    )

    out_shape = (jax.ShapeDtypeStruct((cout, n), jnp.float32),
                 jax.ShapeDtypeStruct((cout, n), jnp.float32))

    return pl.pallas_call(
        _convlstm_cell_kernel,
        out_shape=out_shape,
        grid_spec=pltpu.PrefetchScalarGridSpec(
            num_scalar_prefetch=0,
            grid=(n // tn,),
            in_specs=[
                pl.BlockSpec((gc, kpad), lambda j: (0, 0)),
                pl.BlockSpec((gc, 1), lambda j: (0, 0)),
                pl.BlockSpec((kpad, tn), lambda j: (0, j)),
                pl.BlockSpec((cout, tn), lambda j: (0, j)),
            ],
            out_specs=[
                pl.BlockSpec((cout, tn), lambda j: (0, j)),
                pl.BlockSpec((cout, tn), lambda j: (0, j)),
            ],
        ),
        compiler_params=pltpu.CompilerParams(
            dimension_semantics=("parallel",)),
        input_output_aliases={3: 1},     # reuse c_prev's buffer for c_new
        cost_estimate=cost,
    )(w_t, b, x_col_t, c_prev)


# --------------------------------------------------------------------------
# Jitted per-timestep glue (layout, im2col, bf16 cast) around the kernel
# --------------------------------------------------------------------------
def _concat_inputs_cbhw(inputs, height, width):
    """Concatenate the input list along channels in (C, B, H, W) layout."""
    bs = inputs[0].shape[0]
    parts = []
    for t in inputs:
        if t.ndim == 2:                       # (bs, f) -> (bs, f, H, W)
            t = jnp.broadcast_to(t[:, :, None, None],
                                 (bs, t.shape[1], height, width))
        parts.append(jnp.transpose(t, (1, 0, 2, 3)))   # (f, bs, H, W)
    return jnp.concatenate(parts, axis=0)


@functools.partial(jax.jit, static_argnames=("height", "width"),
                   donate_argnums=(2,))
def _convlstm_step(inputs, h, c, w_t, b, *, height, width):
    """One ConvLSTM cell step.

    inputs : tuple of (B, f_i, H, W) / (B, f_i) arrays (sum f_i == in_planes)
    h, c   : (Cout, B*H*W) f32 recurrent state in compute layout
    w_t    : (4*Cout, Kpad) bf16 ; b : (4*Cout, 1) f32
    Returns (out_nchw, h_new, c_new).
    """
    bs = inputs[0].shape[0]
    cout = c.shape[0]
    hw = height * width

    x_cb = _concat_inputs_cbhw(inputs, height, width)        # (Cin_x, B, H, W)
    h_cb = h.reshape(cout, bs, height, width)                 # (Cout, B, H, W)
    xh = jnp.concatenate([x_cb, h_cb], axis=0)                # (Cin,  B, H, W)
    cin = xh.shape[0]

    # im2col (glue): 3x3 SAME patches, transposed so K is the leading axis,
    # flattening order (dy, dx, cin) to match the weight layout.
    xh_pad = jnp.pad(xh, ((0, 0), (0, 0), (1, 1), (1, 1)))
    taps = [xh_pad[:, :, dy:dy + height, dx:dx + width]
            for dy in range(3) for dx in range(3)]
    x_col_t = jnp.stack(taps, axis=0).reshape(9 * cin, bs * hw)
    kpad = w_t.shape[1]
    x_col_t = jnp.pad(x_col_t, ((0, kpad - 9 * cin), (0, 0)))
    x_col_t = x_col_t.astype(jnp.bfloat16)

    h_new, c_new = convlstm_cell_pallas(w_t, b, x_col_t, c)

    out = jnp.transpose(h_new.reshape(cout, bs, height, width), (1, 0, 2, 3))
    return out, h_new, c_new


# --------------------------------------------------------------------------
# Python wrapper mirroring the PyTorch ConvLSTM module
# --------------------------------------------------------------------------
class ConvLSTMPallas:
    def __init__(self, in_planes: int, out_planes: int,
                 size: Tuple[int, int], key):
        self.in_planes = in_planes
        self.out_planes = out_planes
        self.height, self.width = size

        cin = in_planes + out_planes            # conv input = concat([x, h])
        kw, kb = jax.random.split(key)
        fan_in = cin * 3 * 3
        bound = 1.0 / (fan_in ** 0.5)
        # PyTorch Conv2d layout: (4*out_planes, cin, 3, 3), gate-major (i,f,o,g)
        self.w_oihw = jax.random.uniform(
            kw, (4 * out_planes, cin, 3, 3), jnp.float32, -bound, bound)
        self.b_flat = jax.random.uniform(
            kb, (4 * out_planes,), jnp.float32, -bound, bound)

        # Kernel layout: fused + transposed weights (4*Cout, 9*Cin), flattening
        # order (dy, dx, cin), zero-padded on K to a multiple of 128, bf16.
        k = 9 * cin
        kpad = ((k + 127) // 128) * 128
        w_t = jnp.transpose(self.w_oihw, (0, 2, 3, 1)).reshape(
            4 * out_planes, k)
        self.w_t = jnp.pad(w_t, ((0, 0), (0, kpad - k))).astype(jnp.bfloat16)
        self.b = self.b_flat.reshape(4 * out_planes, 1)

        # nn.Parameter(torch.zeros(out_planes, H, W)) -- zeros, deterministic
        self.initial_hidden_state = jnp.zeros(
            (out_planes, self.height, self.width), jnp.float32)
        self.initial_hidden_cell_state = jnp.zeros(
            (out_planes, self.height, self.width), jnp.float32)
        self._h = None
        self._c = None

    def reinit_memory(self):
        self._h = None
        self._c = None

    def forward(self, inputs: List[jax.Array]) -> jax.Array:
        bs = inputs[0].shape[0]
        hw = self.height * self.width
        cout = self.out_planes

        if self._h is None:   # initial_hidden_state.repeat((bs, 1, 1, 1))
            self._h = jnp.broadcast_to(
                self.initial_hidden_state.reshape(cout, 1, hw),
                (cout, bs, hw)).reshape(cout, bs * hw)
            self._c = jnp.broadcast_to(
                self.initial_hidden_cell_state.reshape(cout, 1, hw),
                (cout, bs, hw)).reshape(cout, bs * hw)

        out, self._h, self._c = _convlstm_step(
            tuple(inputs), self._h, self._c, self.w_t, self.b,
            height=self.height, width=self.width)
        return out


# --------------------------------------------------------------------------
# Pure-JAX reference (lax.conv, bf16 MXU inputs) for correctness checking
# --------------------------------------------------------------------------
def _concat_inputs_nchw(inputs, height, width):
    bs = inputs[0].shape[0]
    parts = []
    for t in inputs:
        if t.ndim == 2:
            t = jnp.broadcast_to(t[:, :, None, None],
                                 (bs, t.shape[1], height, width))
        parts.append(t)
    return jnp.concatenate(parts, axis=1)


def reference_forward(model: ConvLSTMPallas, inputs_seq):
    bs = inputs_seq[0][0].shape[0]
    hgt, wid, cout = model.height, model.width, model.out_planes
    h = jnp.broadcast_to(model.initial_hidden_state[None], (bs, cout, hgt, wid))
    c = jnp.broadcast_to(model.initial_hidden_cell_state[None],
                         (bs, cout, hgt, wid))
    outs = []
    for inputs in inputs_seq:
        x = _concat_inputs_nchw(inputs, hgt, wid)
        xh = jnp.concatenate([x, h], axis=1)
        gates = jax.lax.conv_general_dilated(
            xh.astype(jnp.bfloat16), model.w_oihw.astype(jnp.bfloat16),
            (1, 1), "SAME", dimension_numbers=("NCHW", "OIHW", "NCHW"),
            preferred_element_type=jnp.float32)
        gates = gates + model.b_flat[None, :, None, None]
        i, f, o, g = jnp.split(gates, 4, axis=1)
        i, f, o = jax.nn.sigmoid(i), jax.nn.sigmoid(f), jax.nn.sigmoid(o)
        g = jnp.tanh(g)
        c = f * c + i * g
        h = o * jnp.tanh(c)
        outs.append(h)
    return outs


# --------------------------------------------------------------------------
if __name__ == "__main__":
    key = jax.random.PRNGKey(0)
    k_param, kx1, kx2, kx3 = jax.random.split(key, 4)

    B, in_planes, out_planes, H, W = 2, 4, 8, 16, 16

    model = ConvLSTMPallas(in_planes, out_planes, (H, W), k_param)
    model.reinit_memory()

    # inputs: list whose feature dims sum to in_planes (one spatial, one flat)
    x_spatial_1 = jax.random.normal(kx1, (B, 3, H, W), jnp.float32)
    x_vec = jax.random.normal(kx2, (B, 1), jnp.float32)
    x_spatial_2 = jax.random.normal(kx3, (B, 3, H, W), jnp.float32)

    out1 = jax.block_until_ready(model.forward([x_spatial_1, x_vec]))
    out2 = jax.block_until_ready(model.forward([x_spatial_2, x_vec]))
    assert out1.shape == (B, out_planes, H, W)
    assert out2.shape == (B, out_planes, H, W)

    ref1, ref2 = reference_forward(
        model, [[x_spatial_1, x_vec], [x_spatial_2, x_vec]])
    # bf16 MXU inputs (f32 accumulation): compare against the bf16-input conv
    # reference with a correspondingly relaxed tolerance.
    assert jnp.allclose(out1, ref1, atol=3e-3, rtol=1e-3), (
        float(jnp.max(jnp.abs(out1 - ref1))))
    assert jnp.allclose(out2, ref2, atol=3e-3, rtol=1e-3), (
        float(jnp.max(jnp.abs(out2 - ref2))))

    print("KERNEL_OK")
</pallas_src>

<mosaic_0001>
module attributes {stable_mosaic.version = 11 : i64} {
  func.func @_convlstm_cell_kernel(%arg0: i32, %arg1: memref<32x128xbf16, #tpu.memory_space<vmem>>, %arg2: memref<32x1xf32, #tpu.memory_space<vmem>>, %arg3: memref<128x256xbf16, #tpu.memory_space<vmem>>, %arg4: memref<8x256xf32, #tpu.memory_space<vmem>>, %arg5: memref<8x256xf32, #tpu.memory_space<vmem>>, %arg6: memref<8x256xf32, #tpu.memory_space<vmem>>) attributes {dimension_semantics = [#tpu.dimension_semantics<parallel>], iteration_bounds = array<i64: 2>, scalar_prefetch = 0 : i64, scratch_operands = 0 : i64, tpu.core_type = #tpu.core_type<tc>, window_params = [{pipeline_mode = #tpu.pipeline_mode<synchronous>, transform_indices = @transform_0, window_bounds = array<i64: 32, 128>}, {pipeline_mode = #tpu.pipeline_mode<synchronous>, transform_indices = @transform_1, window_bounds = array<i64: 32, 1>}, {transform_indices = @transform_2, window_bounds = array<i64: 128, 256>}, {transform_indices = @transform_3, window_bounds = array<i64: 8, 256>}, {transform_indices = @transform_4, window_bounds = array<i64: 8, 256>}, {transform_indices = @transform_5, window_bounds = array<i64: 8, 256>}]} {
    %c0 = arith.constant 0 : index
    %c0_0 = arith.constant 0 : index
    %0 = vector.load %arg1[%c0, %c0_0] : memref<32x128xbf16, #tpu.memory_space<vmem>>, vector<32x128xbf16>
    %c0_1 = arith.constant 0 : index
    %c0_2 = arith.constant 0 : index
    %1 = vector.load %arg3[%c0_1, %c0_2] : memref<128x256xbf16, #tpu.memory_space<vmem>>, vector<128x256xbf16>
    %cst = arith.constant dense<0.000000e+00> : vector<32x256xf32>
    %2 = tpu.matmul %0, %1, %cst {dimension_numbers = #tpu.dot_dimension_numbers<[1], [0], [0], [1], [0, 0, 1, 1], [], []>} : vector<32x128xbf16>, vector<128x256xbf16>, vector<32x256xf32> -> vector<32x256xf32>
    %c0_3 = arith.constant 0 : index
    %c0_4 = arith.constant 0 : index
    %3 = vector.load %arg2[%c0_3, %c0_4] : memref<32x1xf32, #tpu.memory_space<vmem>>, vector<32x1xf32>
    %4 = vector.broadcast %3 : vector<32x1xf32> to vector<32x256xf32>
    %5 = arith.addf %2, %4 : vector<32x256xf32>
    %6 = vector.extract_strided_slice %5 {offsets = [0, 0], sizes = [8, 256], strides = [1, 1]} : vector<32x256xf32> to vector<8x256xf32>
    %7 = arith.negf %6 : vector<8x256xf32>
    %8 = math.exp %7 : vector<8x256xf32>
    %cst_5 = arith.constant 1.000000e+00 : f32
    %9 = vector.broadcast %cst_5 : f32 to vector<8x256xf32>
    %10 = arith.addf %9, %8 : vector<8x256xf32>
    %11 = arith.divf %9, %10 : vector<8x256xf32>
    %12 = vector.extract_strided_slice %5 {offsets = [8, 0], sizes = [8, 256], strides = [1, 1]} : vector<32x256xf32> to vector<8x256xf32>
    %13 = arith.negf %12 : vector<8x256xf32>
    %14 = math.exp %13 : vector<8x256xf32>
    %cst_6 = arith.constant 1.000000e+00 : f32
    %15 = vector.broadcast %cst_6 : f32 to vector<8x256xf32>
    %16 = arith.addf %15, %14 : vector<8x256xf32>
    %17 = arith.divf %15, %16 : vector<8x256xf32>
    %18 = vector.extract_strided_slice %5 {offsets = [16, 0], sizes = [8, 256], strides = [1, 1]} : vector<32x256xf32> to vector<8x256xf32>
    %19 = arith.negf %18 : vector<8x256xf32>
    %20 = math.exp %19 : vector<8x256xf32>
    %cst_7 = arith.constant 1.000000e+00 : f32
    %21 = vector.broadcast %cst_7 : f32 to vector<8x256xf32>
    %22 = arith.addf %21, %20 : vector<8x256xf32>
    %23 = arith.divf %21, %22 : vector<8x256xf32>
    %24 = vector.extract_strided_slice %5 {offsets = [24, 0], sizes = [8, 256], strides = [1, 1]} : vector<32x256xf32> to vector<8x256xf32>
    %25 = math.tanh %24 : vector<8x256xf32>
    %c0_8 = arith.constant 0 : index
    %c0_9 = arith.constant 0 : index
    %26 = vector.load %arg4[%c0_8, %c0_9] : memref<8x256xf32, #tpu.memory_space<vmem>>, vector<8x256xf32>
    %27 = arith.mulf %17, %26 : vector<8x256xf32>
    %28 = arith.mulf %11, %25 : vector<8x256xf32>
    %29 = arith.addf %27, %28 : vector<8x256xf32>
    %30 = math.tanh %29 : vector<8x256xf32>
    %31 = arith.mulf %23, %30 : vector<8x256xf32>
    %c0_10 = arith.constant 0 : index
    %c0_11 = arith.constant 0 : index
    %32 = vector.load %arg5[%c0_10, %c0_11] : memref<8x256xf32, #tpu.memory_space<vmem>>, vector<8x256xf32>
    tpu.vector_store %arg5[%c0_10, %c0_11], %31 {strides = array<i32>} : memref<8x256xf32, #tpu.memory_space<vmem>>, vector<8x256xf32>,
    %c0_12 = arith.constant 0 : index
    %c0_13 = arith.constant 0 : index
    %33 = vector.load %arg6[%c0_12, %c0_13] : memref<8x256xf32, #tpu.memory_space<vmem>>, vector<8x256xf32>
    tpu.vector_store %arg6[%c0_12, %c0_13], %29 {strides = array<i32>} : memref<8x256xf32, #tpu.memory_space<vmem>>, vector<8x256xf32>,
    return
  }
  func.func @transform_0(%arg0: i32) -> (i32, i32) {
    %c0_i32 = arith.constant 0 : i32
    %c0_i32_0 = arith.constant 0 : i32
    %c0_i32_1 = arith.constant 0 : i32
    return %c0_i32, %c0_i32_0 : i32, i32
  }
  func.func @transform_1(%arg0: i32) -> (i32, i32) {
    %c0_i32 = arith.constant 0 : i32
    %c0_i32_0 = arith.constant 0 : i32
    %c0_i32_1 = arith.constant 0 : i32
    return %c0_i32, %c0_i32_0 : i32, i32
  }
  func.func @transform_2(%arg0: i32) -> (i32, i32) {
    %c0_i32 = arith.constant 0 : i32
    %c0_i32_0 = arith.constant 0 : i32
    return %c0_i32, %arg0 : i32, i32
  }
  func.func @transform_3(%arg0: i32) -> (i32, i32) {
    %c0_i32 = arith.constant 0 : i32
    %c0_i32_0 = arith.constant 0 : i32
    return %c0_i32, %arg0 : i32, i32
  }
  func.func @transform_4(%arg0: i32) -> (i32, i32) {
    %c0_i32 = arith.constant 0 : i32
    %c0_i32_0 = arith.constant 0 : i32
    return %c0_i32, %arg0 : i32, i32
  }
  func.func @transform_5(%arg0: i32) -> (i32, i32) {
    %c0_i32 = arith.constant 0 : i32
    %c0_i32_0 = arith.constant 0 : i32
    return %c0_i32, %arg0 : i32, i32
  }
}

</mosaic_0001>

<bundles_post_ra>
// kernel: _convlstm_step.1
= control target key start
LH: loop header
LB: loop body
LE: loop exit
PB: predicated region body
PF: predicated region fallthrough
CT: control target
= control target key end

     0   :  { %s909_s18 = smov 0   ;;  %s911_s19 = smov 0   ;;  %s1026_s0 = inlined_call_operand.vmem [shape: bf16[32,128], index: 0, kind: input, shape index: {}]   ;;  %s1027_s1 = inlined_call_operand.vmem [shape: f32[32,1], index: 1, kind: input, shape index: {}]   ;;  %s1028_s2 = inlined_call_operand.vmem [shape: bf16[128,512], index: 2, kind: input, shape index: {}]   ;;  %s1029_s3 = inlined_call_operand.vmem [shape: f32[8,512], index: 3, kind: input, shape index: {}, may-alias: {3,5}]   ;;  %s1030_s4 = inlined_call_operand.vmem [shape: f32[8,512], index: 4, kind: output, shape index: {0}]   ;;  %s1031_s5 = inlined_call_operand.vmem [shape: f32[8,512], index: 5, kind: output, shape index: {1}, may-alias: {3,5}]  }
   0x1   :  { %s913_s20 = smov 0  }
   0x2 LB: > { %s711_s21 = sadd.s32 4294967295, %s876_s20   ;;  %s926_s22 = sadd.s32 1, %s876_s20   ;;  %s876_s20 = sphi %s913_s20, %s1034_s20   ;;  %s872_s19 = sphi %s911_s19, %s1033_s19   ;;  %s868_s18 = sphi %s909_s18, %s1032_s18  }
   0x3   : > { %s62_s23 = ssub.s32 %s876_s20, %s926_s22  ;;  %s65_s24 = sadd.s32 1, %s872_s19 }
   0x4   : > { %p63_p0 = scmp.eq.s32.totalorder %s62_s23, 0  ;;  %p72_p1 = scmp.ne.s32.totalorder %s872_s19, %s868_s18 }
   0x5   : > { %p73_p2 = scmp.eq.s32.totalorder %s876_s20, 0  ;;  %p714_p4 = scmp.ge.s32.totalorder %s876_s20, 2 }
   0x6   : > { %s935_s25 = scalar_select %p63_p0, %s872_s19, %s65_s24  }
   0x7   : > { %p74_p3 = por %p73_p2, %p72_p1  ;;  %182 = sbr.rel (%p714_p4) target bundleno = 24 (0x18), region = 24 }
   0xc   : > { %185 = sbr.rel (!%p74_p3) target bundleno = 24 (0x18), region = 28  ;;  %s187_s26 = sand.u32 (%p74_p3), 1, %s872_s19  }
   0xd   : > { %s752_s27 = sshll.u32 (%p74_p3), %s876_s20, 3  ;;  %s715_s28 = sshll.u32 (%p74_p3), %s187_s26, 7 }
   0xe   : > { %s943_s6 = scalar_lea.vmem (%p74_p3), %s1028_s2, %s752_s27  ;;  %s189_s7 = scalar_lea.vmem (%p74_p3), [#allocation2], %s715_s28 }
   0xf   : > { %v251_v0 = vld [vmem:[%s943_s6] sm:$0xff] (%p74_p3)  ;;  %v253_v1 = vld [vmem:[%s943_s6 + $0x10] sm:$0xff] (%p74_p3) }
  0x10   : > { %v255_v2 = vld [vmem:[%s943_s6 + $0x20] sm:$0xff] (%p74_p3)  ;;  %252 = vst [vmem:[%s189_s7] sm:$0xff] (%p74_p3), %v251_v0  ;;  %254 = vst [vmem:[%s189_s7 + $0x8] sm:$0xff] (%p74_p3), %v253_v1  ;;  %v257_v3 = vld [vmem:[%s943_s6 + $0x30] sm:$0xff] (%p74_p3) }
  0x11   : > { %256 = vst [vmem:[%s189_s7 + $0x10] sm:$0xff] %v255_v2  ;;  %v259_v4 = vld [vmem:[%s943_s6 + $0x40] sm:$0xff]  ;;  %v261_v5 = vld [vmem:[%s943_s6 + $0x50] sm:$0xff]  ;;  %258 = vst [vmem:[%s189_s7 + $0x18] sm:$0xff] %v257_v3 }
  0x12   : > { %260 = vst [vmem:[%s189_s7 + $0x20] sm:$0xff] %v259_v4  ;;  %262 = vst [vmem:[%s189_s7 + $0x28] sm:$0xff] %v261_v5  ;;  %v263_v6 = vld [vmem:[%s943_s6 + $0x60] sm:$0xff]  ;;  %v265_v7 = vld [vmem:[%s943_s6 + $0x70] sm:$0xff] }
  0x13   : > { %v267_v8 = vld [vmem:[%s943_s6 + $0x80] sm:$0xff]  ;;  %264 = vst [vmem:[%s189_s7 + $0x30] sm:$0xff] %v263_v6  ;;  %266 = vst [vmem:[%s189_s7 + $0x38] sm:$0xff] %v265_v7  ;;  %v269_v9 = vld [vmem:[%s943_s6 + $0x90] sm:$0xff] }
  0x14   : > { %268 = vst [vmem:[%s189_s7 + $0x40] sm:$0xff] %v267_v8  ;;  %v271_v10 = vld [vmem:[%s943_s6 + $0xa0] sm:$0xff]  ;;  %v273_v11 = vld [vmem:[%s943_s6 + $0xb0] sm:$0xff]  ;;  %270 = vst [vmem:[%s189_s7 + $0x48] sm:$0xff] %v269_v9 }
  0x15   : > { %272 = vst [vmem:[%s189_s7 + $0x50] sm:$0xff] %v271_v10  ;;  %274 = vst [vmem:[%s189_s7 + $0x58] sm:$0xff] %v273_v11  ;;  %v275_v12 = vld [vmem:[%s943_s6 + $0xc0] sm:$0xff]  ;;  %v277_v13 = vld [vmem:[%s943_s6 + $0xd0] sm:$0xff] }
  0x16   : > { %v279_v14 = vld [vmem:[%s943_s6 + $0xe0] sm:$0xff]  ;;  %276 = vst [vmem:[%s189_s7 + $0x60] sm:$0xff] %v275_v12  ;;  %278 = vst [vmem:[%s189_s7 + $0x68] sm:$0xff] %v277_v13  ;;  %v281_v15 = vld [vmem:[%s943_s6 + $0xf0] sm:$0xff] }
  0x17   : > { %280 = vst [vmem:[%s189_s7 + $0x70] sm:$0xff] %v279_v14  ;;  %282 = vst [vmem:[%s189_s7 + $0x78] sm:$0xff] %v281_v15 }
  0x18 PF: > { %p718_p5 = scmp.ge.s32.totalorder %s876_s20, 1  ;;  %p296_p6 = scmp.lt.s32.totalorder %s876_s20, 3 }
  0x1a   : > { %p297_p7 = pnand %p718_p5, %p296_p6 }
  0x1b   : > { %s303_s8 = sand.u32 (!%p297_p7), 1, %s868_s18   ;;  %s720_s28 = sshll.u32 (!%p297_p7), %s711_s21, 1 }
  0x1c   : > { %300 = sbr.rel (%p297_p7) target bundleno = 322 (0x142), region = 70  ;;  %s719_s9 = sshll.u32 (!%p297_p7), %s303_s8, 7 }
  0x1d   : > { %s967_s12 = scalar_lea.vmem (!%p297_p7), [#allocation2], %s719_s9  ;;  %p342_p8 = scmp.lt.s32.totalorder (!%p297_p7), %s720_s28, 3 }
  0x21   : > { %v878_v16 = vmov 0   ;;  %v380_v17 = vld [vmem:[%s1027_s1] sm:$0xff]  ;;  %v796_v18 = vld [vmem:[%s967_s12 + $0x74] ss:$8 sps:$4 sm:$0xff]   ;;  %v798_v19 = vld [vmem:[%s967_s12 + $0x70] ss:$8 sps:$4 sm:$0xff]  }
  0x22   : > { %528 = vmatprep.mubr.bf16.mxu0 %v878_v16  ;;  %538 = vmatprep.mubr.bf16.mxu1 %v878_v16  ;;  %v799_v20 = vld [vmem:[%s967_s12 + $0x64] ss:$8 sps:$4 sm:$0xff]   ;;  %v801_v22 = vld [vmem:[%s967_s12 + $0x60] ss:$8 sps:$4 sm:$0xff]   ;;  %v802_v23 = vld [vmem:[%s967_s12 + $0x54] ss:$8 sps:$4 sm:$0xff]  }
  0x23   : > { %794 = vset.pattern.permute.xlu0 %v878_v16  ;;  %795 = vset.pattern.permute.xlu1 %v878_v16  ;;  %v381_v21 = vld [vmem:[%s1027_s1 + $0x8] sm:$0xff]  ;;  %v804_v24 = vld [vmem:[%s967_s12 + $0x50] ss:$8 sps:$4 sm:$0xff]   ;;  %v808_v28 = vld [vmem:[%s967_s12 + $0x34] ss:$8 sps:$4 sm:$0xff]   ;;  %s1036_s28 = smov (!%p342_p8, %s720_s28), 3 }
  0x24   : > { %386 = vperm.xlu0 %794, %v380_v17   ;;  %496 = vmatprep.subr.bf16.mxu0 %v796_v18  ;;  %v805_v25 = vld [vmem:[%s967_s12 + $0x44] ss:$8 sps:$4 sm:$0xff]   ;;  %v382_v26 = vld [vmem:[%s1027_s1 + $0x10] sm:$0xff]  ;;  %v807_v27 = vld [vmem:[%s967_s12 + $0x40] ss:$8 sps:$4 sm:$0xff]   ;;  %s1002_s20 = sshll.u32 %s1036_s28, 3 }
  0x25   : > { %753 = vmatprep.subr.bf16.mxu1 %v796_v18  ;;  %497 = vmatpush1.bf16.msra.mxu0 %v798_v19  ;;  %v383_v29 = vld [vmem:[%s1027_s1 + $0x18] sm:$0xff]  ;;  %v811_v31 = vld [vmem:[%s967_s12 + $0x24] ss:$8 sps:$4 sm:$0xff]   ;;  %v813_v32 = vld [vmem:[%s967_s12 + $0x20] ss:$8 sps:$4 sm:$0xff]   ;;  %s345_s30 = scalar_lea.vmem %s1029_s3, %s1002_s20  ;;  %s357_s8 = scalar_lea.vmem %s1031_s5, %s1002_s20 }
  0x26   : > { %761 = vmatpush1.bf16.msra.mxu1 %v798_v19  ;;  %498 = vmatprep.subr.bf16.mxu0 %v799_v20  ;;  %v810_v30 = vld [vmem:[%s967_s12 + $0x30] ss:$8 sps:$4 sm:$0xff]   ;;  %v814_v33 = vld [vmem:[%s967_s12 + $0x14] ss:$8 sps:$4 sm:$0xff]   ;;  %v817_v35 = vld [vmem:[%s967_s12 + $0x4] ss:$8 sps:$4 sm:$0xff]   ;;  %s351_s11 = scalar_lea.vmem %s1030_s4, %s1002_s20 }
  0x27   : > { %754 = vmatprep.subr.bf16.mxu1 %v799_v20  ;;  %396 = vperm.xlu1 %795, %v382_v26   ;;  %v816_v34 = vld [vmem:[%s967_s12 + $0x10] ss:$8 sps:$4 sm:$0xff]   ;;  %v819_v36 = vld [vmem:[%s967_s12] ss:$8 sps:$4 sm:$0xff]  }
  0x28   : > { %391 = vperm.xlu0 %794, %v381_v21   ;;  %v820_v37 = vld [vmem:[%s1026_s0] sm:$0xff]   ;;  %v821_v38 = vld [vmem:[%s1026_s0 + $0x8] sm:$0xff]  }
  0x29   : > { %499 = vmatpush1.bf16.msra.mxu0 %v801_v22  ;;  %v587_v13 = vld [vmem:[%s345_s30] sm:$0xff]  ;;  %v588_v17 = vld [vmem:[%s345_s30 + $0x8] sm:$0xff] }
  0x2a   : > { %762 = vmatpush1.bf16.msra.mxu1 %v801_v22  ;;  %500 = vmatprep.subr.bf16.mxu0 %v802_v23 }
  0x2b   : > { %755 = vmatprep.subr.bf16.mxu1 %v802_v23  ;;  %401 = vperm.xlu1 %795, %v383_v29  }
  0x2d   : > { %501 = vmatpush1.bf16.msra.mxu0 %v804_v24 }
  0x2e   : > { %763 = vmatpush1.bf16.msra.mxu1 %v804_v24  ;;  %502 = vmatprep.subr.bf16.mxu0 %v805_v25 }
  0x2f   : > { %756 = vmatprep.subr.bf16.mxu1 %v805_v25 }
  0x31   : > { %503 = vmatpush1.bf16.msra.mxu0 %v807_v27 }
  0x32   : > { %764 = vmatpush1.bf16.msra.mxu1 %v807_v27  ;;  %504 = vmatprep.subr.bf16.mxu0 %v808_v28 }
  0x33   : > { %757 = vmatprep.subr.bf16.mxu1 %v808_v28 }
  0x35   : > { %505 = vmatpush1.bf16.msra.mxu0 %v810_v30 }
  0x36   : > { %765 = vmatpush1.bf16.msra.mxu1 %v810_v30  ;;  %506 = vmatprep.subr.bf16.mxu0 %v811_v31 }
  0x37   : > { %758 = vmatprep.subr.bf16.mxu1 %v811_v31 }
  0x39   : > { %507 = vmatpush1.bf16.msra.mxu0 %v813_v32 }
  0x3a   : > { %766 = vmatpush1.bf16.msra.mxu1 %v813_v32  ;;  %508 = vmatprep.subr.bf16.mxu0 %v814_v33 }
  0x3b   : > { %759 = vmatprep.subr.bf16.mxu1 %v814_v33 }
  0x3d   : > { %509 = vmatpush1.bf16.msra.mxu0 %v816_v34 }
  0x3e   : > { %767 = vmatpush1.bf16.msra.mxu1 %v816_v34  ;;  %510 = vmatprep.subr.bf16.mxu0 %v817_v35 }
  0x3f   : > { %760 = vmatprep.subr.bf16.mxu1 %v817_v35 }
  0x41   : > { %511 = vmatpush1.bf16.msra.mxu0 %v819_v36 }
  0x42   : > { %768 = vmatpush1.bf16.msra.mxu1 %v819_v36 }
  0x44   : > { %529 = vmatmul.mubr.bf16.vlgmr.msra.gmra.mxu0 %v820_v37 }
  0x45   : > { %539 = vmatmul.mubr.bf16.vlgmr.msra.gmra.mxu1 %v821_v38 }
  0x9f   : > { %v387_v39 = vpop.permute.xlu0 %386 }
  0xa2   : > { %v397_v54 = vpop.permute.xlu1 %396 }
  0xa3   : > { %v392_v45 = vpop.permute.xlu0 %391 }
  0xa6   : > { %v402_v59 = vpop.permute.xlu1 %401 }
 0x104   : > { %v530_v40 = vpop.f32.mrf.mxu0 }
 0x105   : > { %v531_v41 = vadd.f32 %v530_v40, %v387_v39  ;;  %v540_v52 = vpop.f32.mrf.mxu1 }
 0x106   : > { %v532_v42 = vpop.f32.mrf.mxu0  ;;  %v541_v56 = vadd.f32 %v540_v52, %v397_v54 }
 0x107   : > { %v744_v43 = vmul.f32 -1.442695, %v531_v41  ;;  %v533_v44 = vadd.f32 %v532_v42, %v387_v39  ;;  %v542_v55 = vpop.f32.mrf.mxu1 }
 0x108   : > { %v534_v46 = vpop.f32.mrf.mxu0  ;;  %v543_v57 = vadd.f32 %v542_v55, %v397_v54  ;;  %v748_v60 = vmul.f32 -1.442695, %v541_v56 }
 0x109   : > { %822 = vpow2.f32 %v744_v43  ;;  %v745_v47 = vmul.f32 -1.442695, %v533_v44  ;;  %v535_v48 = vadd.f32 %v534_v46, %v392_v45  ;;  %v544_v58 = vpop.f32.mrf.mxu1 }
 0x10a   : > { %v536_v49 = vpop.f32.mrf.mxu0  ;;  %v749_v61 = vmul.f32 -1.442695, %v543_v57  ;;  %v545_v63 = vadd.f32 %v544_v58, %v402_v59 }
 0x10b   : > { %824 = vpow2.f32 %v745_v47  ;;  %v746_v50 = vmul.f32 -1.442695, %v535_v48  ;;  %v537_v51 = vadd.f32 %v536_v49, %v392_v45  ;;  %v546_v1 = vpop.f32.mrf.mxu1 }
 0x10c   : > { %v547_v5 = vadd.f32 %v546_v1, %v402_v59 }
 0x10d   : > { %826 = vpow2.f32 %v746_v50  ;;  %v747_v53 = vmul.f32 -1.442695, %v537_v51 }
 0x10f   : > { %828 = vpow2.f32 %v747_v53 }
 0x110   : > { %830 = vpow2.f32 %v748_v60 }
 0x111   : > { %832 = vpow2.f32 %v749_v61 }
 0x112   : > { %834 = vtanh.f32 %v545_v63 }
 0x116   : > { %v823_v62 = vpop.eup %822 }
 0x117   : > { %v555_v0 = vadd.f32 1.0, %v823_v62 }
 0x118   : > { %v825_v2 = vpop.eup %824 }
 0x119   : > { %v556_v3 = vadd.f32 1.0, %v825_v2  ;;  %836 = vrcp.f32 %v555_v0 }
 0x11a   : > { %v827_v4 = vpop.eup %826 }
 0x11b   : > { %v567_v6 = vadd.f32 1.0, %v827_v4  ;;  %838 = vrcp.f32 %v556_v3 }
 0x11c   : > { %v829_v7 = vpop.eup %828 }
 0x11d   : > { %840 = vrcp.f32 %v567_v6  ;;  %v568_v8 = vadd.f32 1.0, %v829_v7  ;;  %v831_v9 = vpop.eup %830 }
 0x11e   : > { %842 = vtanh.f32 %v547_v5  ;;  %v833_v10 = vpop.eup %832  ;;  %v579_v16 = vadd.f32 1.0, %v831_v9 }
 0x11f   : > { %844 = vrcp.f32 %v568_v8  ;;  %v835_v11 = vpop.eup %834  ;;  %v580_v22 = vadd.f32 1.0, %v833_v10 }
 0x120   : > { %846 = vrcp.f32 %v579_v16 }
 0x126   : > { %v837_v12 = vpop.eup %836 }
 0x127   : > { %v591_v20 = vmul.f32 %v837_v12, %v835_v11 }
 0x128   : > { %v839_v14 = vpop.eup %838 }
 0x12a   : > { %v841_v15 = vpop.eup %840 }
 0x12b   : > { %v843_v18 = vpop.eup %842  ;;  %v589_v19 = vmul.f32 %v841_v15, %v587_v13 }
 0x12c   : > { %v845_v21 = vpop.eup %844  ;;  %v592_v25 = vmul.f32 %v843_v18, %v839_v14 }
 0x12d   : > { %v593_v23 = vadd.f32 %v591_v20, %v589_v19  ;;  %v590_v24 = vmul.f32 %v845_v21, %v588_v17  ;;  %v847_v27 = vpop.eup %846 }
 0x12f   : > { %848 = vtanh.f32 %v593_v23  ;;  %v594_v26 = vadd.f32 %v592_v25, %v590_v24  ;;  %601 = vst [vmem:[%s357_s8] sm:$0xff] %v593_v23 }
 0x130   : > { %850 = vrcp.f32 %v580_v22 }
 0x131   : > { %852 = vtanh.f32 %v594_v26  ;;  %602 = vst [vmem:[%s357_s8 + $0x8] sm:$0xff] %v594_v26 }
 0x13c   : > { %v849_v28 = vpop.eup %848 }
 0x13d   : > { %v851_v29 = vpop.eup %850  ;;  %v597_v30 = vmul.f32 %v849_v28, %v847_v27 }
 0x13e   : > { %v853_v31 = vpop.eup %852 }
 0x13f   : > { %599 = vst [vmem:[%s351_s11] sm:$0xff] %v597_v30  ;;  %v598_v32 = vmul.f32 %v853_v31, %v851_v29 }
 0x141   : > { %600 = vst [vmem:[%s351_s11 + $0x8] sm:$0xff] %v598_v32 }
 0x142 PF: > { %p13_p9 = scmp.ge.s32.totalorder %s926_s22, 4   ;;  %s1032_s18 = smov %s872_s19 }
 0x143   : > { %s1033_s19 = smov %s935_s25  ;;  %s1034_s20 = smov %s926_s22 }
 0x144   :  { %15 = sbr.rel (!%p13_p9) target bundleno = 2 (0x2), region = 124 }

</bundles_post_ra>
